<compile_context>
chip_gen: v7x
topology: tpu7x:2x2x1
jax: 0.10.0
libtpu: 0.0.40
codegen_flags: <defaults>
</compile_context>

<pallas_src>
import functools

import jax
import jax.numpy as jnp
from jax.experimental import pallas as pl
from jax.experimental.pallas import tpu as pltpu


def _round_up(x, m):
    return ((x + m - 1) // m) * m


def _bmm_dequant_kernel(x_ref, w_ref, o_ref, *, inv_oscale, compute_dtype):
    # x_ref: (bt, tm, tk), w_ref: (bt, tk, tn) in the narrow storage dtype;
    # o_ref: (bt, tm, tn) float32 (resident accumulator across the k axis).
    k = pl.program_id(3)

    @pl.when(k == 0)
    def _init():
        o_ref[...] = jnp.zeros_like(o_ref)

    # Operands were fake-quantized once in the wrapper; only a cast remains here.
    # bf16 is exact for the int8 grid (|v| <= 128) and keeps the MXU at native
    # rate on v5e/v6e/v7x with f32 accumulation.
    xq = x_ref[...].astype(compute_dtype)
    wq = w_ref[...].astype(compute_dtype)

    o_ref[...] += jnp.einsum(
        "bmk,bkn->bmn", xq, wq, preferred_element_type=jnp.float32
    )

    @pl.when(k == pl.num_programs(3) - 1)
    def _finalize():
        o_ref[...] = o_ref[...] * inv_oscale


def batch_matmul_quant(
    input0,
    input1,
    *,
    bit_width=8,
    dscale=10.0,
    wscale=10.0,
    oscale=10.0,
    tm=512,
    tn=512,
    tk=1024,
    bt=None,
):
    """Quantized torch.bmm equivalent: (B, M, K) x (B, K, N) -> (B, M, N) f32."""
    B, M, K = input0.shape
    B2, K2, N = input1.shape
    assert B == B2 and K == K2, "bmm shape mismatch"

    qmin = float(-(2 ** (bit_width - 1)))
    qmax = float(2 ** (bit_width - 1) - 1)

    # --- Hoisted fake-quant: one mem-bound pass instead of per grid step. ---
    # TODO(synk): jnp.round is round-half-to-even; if the torch/TVM Quant uses
    # round-half-away-from-zero, exact-.5 values differ by one quant step.
    if bit_width <= 8:
        store_dtype = jnp.int8        # 4x less HBM operand traffic than f32
        compute_dtype = jnp.bfloat16  # exact for the int8 grid, works on v7x
    else:
        store_dtype = jnp.float32
        compute_dtype = jnp.float32
    xq = jnp.clip(jnp.round(input0 * dscale), qmin, qmax).astype(store_dtype)
    wq = jnp.clip(jnp.round(input1 * wscale), qmin, qmax).astype(store_dtype)

    # Tile sizes, clamped to the problem and (sublane, lane) aligned.
    tm = min(tm, _round_up(M, 8))
    tn = min(tn, _round_up(N, 128))
    tk = min(tk, _round_up(K, 128))

    # Only the reduction axis needs explicit zero padding (quant(0) == 0, exact).
    # B/M/N edges rely on Pallas boundary blocks: OOB reads there can only
    # contaminate output elements that are dropped on write.
    Kp = _round_up(K, tk)
    if Kp != K:
        xq = jnp.pad(xq, ((0, 0), (0, 0), (0, Kp - K)))
        wq = jnp.pad(wq, ((0, 0), (0, Kp - K), (0, 0)))

    gi = pl.cdiv(M, tm)
    gj = pl.cdiv(N, tn)

    # Batch tile: amortize ~0.35us/grid-step overhead for tiny per-batch matmuls,
    # but keep >= 2 parallel grid steps so both v7x TensorCores get work.
    if bt is None:
        target_macs = 1 << 24
        bt = max(1, min(B, target_macs // max(1, tm * tn * tk)))
        bt = min(bt, 8)
    bt = max(1, min(bt, B))
    if B > 1 and gi * gj * pl.cdiv(B, bt) < 2:
        bt = min(bt, (B + 1) // 2)

    grid = (pl.cdiv(B, bt), gi, gj, Kp // tk)

    kernel = functools.partial(
        _bmm_dequant_kernel,
        inv_oscale=1.0 / float(oscale),
        compute_dtype=compute_dtype,
    )

    # VMEM budget: double-buffered input tiles + their in-kernel casted copies
    # + double-buffered resident f32 output block, 2x headroom, capped at 48 MiB
    # (safe under v7x's 64 MiB physical VMEM; well above default scoped limits).
    in_elt = jnp.dtype(store_dtype).itemsize
    cmp_elt = jnp.dtype(compute_dtype).itemsize
    vmem_est = (
        2 * bt * (tm * tk + tk * tn) * in_elt
        + bt * (tm * tk + tk * tn) * cmp_elt
        + 2 * bt * tm * tn * 4
    )
    vmem_limit = int(min(max(2 * vmem_est, 32 * 1024 * 1024), 48 * 1024 * 1024))

    return pl.pallas_call(
        kernel,
        out_shape=jax.ShapeDtypeStruct((B, M, N), jnp.float32),
        grid_spec=pltpu.PrefetchScalarGridSpec(
            num_scalar_prefetch=0,
            grid=grid,
            in_specs=[
                pl.BlockSpec((bt, tm, tk), lambda b, i, j, k: (b, i, k)),
                pl.BlockSpec((bt, tk, tn), lambda b, i, j, k: (b, k, j)),
            ],
            out_specs=pl.BlockSpec((bt, tm, tn), lambda b, i, j, k: (b, i, j)),
        ),
        compiler_params=pltpu.CompilerParams(
            dimension_semantics=("parallel", "parallel", "parallel", "arbitrary"),
            vmem_limit_bytes=vmem_limit,
        ),
        cost_estimate=pl.CostEstimate(
            flops=2 * B * M * N * K,
            transcendentals=0,
            bytes_accessed=in_elt * (B * M * K + B * K * N) + 4 * B * M * N,
        ),
    )(xq, wq)


def _reference(input0, input1, *, bit_width=8, dscale=10.0, wscale=10.0, oscale=10.0):
    qmin = -(2 ** (bit_width - 1))
    qmax = 2 ** (bit_width - 1) - 1
    xq = jnp.clip(jnp.round(input0 * dscale), qmin, qmax)
    wq = jnp.clip(jnp.round(input1 * wscale), qmin, qmax)
    return jnp.einsum("bmk,bkn->bmn", xq, wq) / oscale


if __name__ == "__main__":
    key = jax.random.PRNGKey(0)
    k0, k1, k2, k3 = jax.random.split(key, 4)

    # Primary small test (torch.bmm layout: (B, M, K) x (B, K, N)).
    B, M, K, N = 2, 8, 32, 16
    input0 = jax.random.normal(k0, (B, M, K), dtype=jnp.float32)
    input1 = jax.random.normal(k1, (B, K, N), dtype=jnp.float32)

    out = batch_matmul_quant(
        input0, input1, bit_width=8, dscale=10.0, wscale=10.0, oscale=10.0
    )
    out = jax.block_until_ready(out)
    ref = _reference(input0, input1)
    assert out.shape == (B, M, N)
    assert jnp.allclose(out, ref, atol=1e-5, rtol=1e-5)

    # Non-divisible-shape check: exercises the unpadded B/M/N boundary blocks.
    Br, Mr, Kr, Nr = 3, 13, 45, 27
    a_r = jax.random.normal(k2, (Br, Mr, Kr), dtype=jnp.float32)
    b_r = jax.random.normal(k3, (Br, Kr, Nr), dtype=jnp.float32)
    out_r = jax.block_until_ready(batch_matmul_quant(a_r, b_r))
    ref_r = _reference(a_r, b_r)
    assert out_r.shape == (Br, Mr, Nr)
    assert jnp.allclose(out_r, ref_r, atol=1e-5, rtol=1e-5)

    print("KERNEL_OK")
</pallas_src>

<mosaic_0001>
module attributes {stable_mosaic.version = 11 : i64} {
  func.func @_bmm_dequant_kernel(%arg0: i32, %arg1: i32, %arg2: i32, %arg3: i32, %arg4: memref<1x8x128xi8, #tpu.memory_space<vmem>>, %arg5: memref<1x128x128xi8, #tpu.memory_space<vmem>>, %arg6: memref<1x8x128xf32, #tpu.memory_space<vmem>>) attributes {dimension_semantics = [#tpu.dimension_semantics<parallel>, #tpu.dimension_semantics<parallel>, #tpu.dimension_semantics<parallel>, #tpu.dimension_semantics<arbitrary>], iteration_bounds = array<i64: 2, 1, 1, 1>, scalar_prefetch = 0 : i64, scratch_operands = 0 : i64, tpu.core_type = #tpu.core_type<tc>, window_params = [{transform_indices = @transform_0, window_bounds = array<i64: 1, 8, 128>}, {transform_indices = @transform_1, window_bounds = array<i64: 1, 128, 128>}, {transform_indices = @transform_2, window_bounds = array<i64: 1, 8, 128>}]} {
    %c0_i32 = arith.constant 0 : i32
    %0 = arith.cmpi eq, %arg3, %c0_i32 : i32
    %1 = arith.extui %0 : i1 to i32
    %c0_i32_0 = arith.constant 0 : i32
    %2 = arith.cmpi ne, %1, %c0_i32_0 : i32
    scf.if %2 {
      %cst_14 = arith.constant 0.000000e+00 : f32
      %14 = vector.broadcast %cst_14 : f32 to vector<1x8x128xf32>
      %c0_15 = arith.constant 0 : index
      %c0_16 = arith.constant 0 : index
      %c0_17 = arith.constant 0 : index
      %15 = vector.load %arg6[%c0_15, %c0_16, %c0_17] : memref<1x8x128xf32, #tpu.memory_space<vmem>>, vector<1x8x128xf32>
      tpu.vector_store %arg6[%c0_15, %c0_16, %c0_17], %14 {strides = array<i32>} : memref<1x8x128xf32, #tpu.memory_space<vmem>>, vector<1x8x128xf32>,
    } else {
    }
    %c0 = arith.constant 0 : index
    %c0_1 = arith.constant 0 : index
    %c0_2 = arith.constant 0 : index
    %3 = vector.load %arg4[%c0, %c0_1, %c0_2] : memref<1x8x128xi8, #tpu.memory_space<vmem>>, vector<1x8x128xi8>
    %4 = arith.sitofp %3 : vector<1x8x128xi8> to vector<1x8x128xbf16>
    %c0_3 = arith.constant 0 : index
    %c0_4 = arith.constant 0 : index
    %c0_5 = arith.constant 0 : index
    %5 = vector.load %arg5[%c0_3, %c0_4, %c0_5] : memref<1x128x128xi8, #tpu.memory_space<vmem>>, vector<1x128x128xi8>
    %6 = arith.sitofp %5 : vector<1x128x128xi8> to vector<1x128x128xbf16>
    %c0_6 = arith.constant 0 : index
    %c0_7 = arith.constant 0 : index
    %c0_8 = arith.constant 0 : index
    %7 = vector.load %arg6[%c0_6, %c0_7, %c0_8] : memref<1x8x128xf32, #tpu.memory_space<vmem>>, vector<1x8x128xf32>
    "tpu.trace_start"() <{level = 10 : i32, message = "bmk,bkn->bmn"}> : () -> ()
    %cst = arith.constant dense<0.000000e+00> : vector<1x8x128xf32>
    %8 = tpu.matmul %4, %6, %cst {dimension_numbers = #tpu.dot_dimension_numbers<[2], [1], [1], [2], [0, 0, 0, 1, 1, 2], [0], [0]>} : vector<1x8x128xbf16>, vector<1x128x128xbf16>, vector<1x8x128xf32> -> vector<1x8x128xf32>
    "tpu.trace_stop"() : () -> ()
    %9 = arith.addf %7, %8 : vector<1x8x128xf32>
    %c0_9 = arith.constant 0 : index
    %c0_10 = arith.constant 0 : index
    %c0_11 = arith.constant 0 : index
    %10 = vector.load %arg6[%c0_9, %c0_10, %c0_11] : memref<1x8x128xf32, #tpu.memory_space<vmem>>, vector<1x8x128xf32>
    tpu.vector_store %arg6[%c0_9, %c0_10, %c0_11], %9 {strides = array<i32>} : memref<1x8x128xf32, #tpu.memory_space<vmem>>, vector<1x8x128xf32>,
    %c0_i32_12 = arith.constant 0 : i32
    %11 = arith.cmpi eq, %arg3, %c0_i32_12 : i32
    %12 = arith.extui %11 : i1 to i32
    %c0_i32_13 = arith.constant 0 : i32
    %13 = arith.cmpi ne, %12, %c0_i32_13 : i32
    scf.if %13 {
      %c0_14 = arith.constant 0 : index
      %c0_15 = arith.constant 0 : index
      %c0_16 = arith.constant 0 : index
      %14 = vector.load %arg6[%c0_14, %c0_15, %c0_16] : memref<1x8x128xf32, #tpu.memory_space<vmem>>, vector<1x8x128xf32>
      %cst_17 = arith.constant 1.000000e-01 : f32
      %15 = vector.broadcast %cst_17 : f32 to vector<1x8x128xf32>
      %16 = arith.mulf %14, %15 : vector<1x8x128xf32>
      %c0_18 = arith.constant 0 : index
      %c0_19 = arith.constant 0 : index
      %c0_20 = arith.constant 0 : index
      %17 = vector.load %arg6[%c0_18, %c0_19, %c0_20] : memref<1x8x128xf32, #tpu.memory_space<vmem>>, vector<1x8x128xf32>
      tpu.vector_store %arg6[%c0_18, %c0_19, %c0_20], %16 {strides = array<i32>} : memref<1x8x128xf32, #tpu.memory_space<vmem>>, vector<1x8x128xf32>,
    } else {
    }
    return
  }
  func.func @transform_0(%arg0: i32, %arg1: i32, %arg2: i32, %arg3: i32) -> (i32, i32, i32) {
    %c0_i32 = arith.constant 0 : i32
    return %arg0, %arg1, %arg3 : i32, i32, i32
  }
  func.func @transform_1(%arg0: i32, %arg1: i32, %arg2: i32, %arg3: i32) -> (i32, i32, i32) {
    %c0_i32 = arith.constant 0 : i32
    return %arg0, %arg3, %arg2 : i32, i32, i32
  }
  func.func @transform_2(%arg0: i32, %arg1: i32, %arg2: i32, %arg3: i32) -> (i32, i32, i32) {
    %c0_i32 = arith.constant 0 : i32
    return %arg0, %arg1, %arg2 : i32, i32, i32
  }
}

</mosaic_0001>

<bundles_post_ra>
// kernel: tpu_custom_call.1
= control target key start
LH: loop header
LB: loop body
LE: loop exit
PB: predicated region body
PF: predicated region fallthrough
CT: control target
= control target key end

     0   :  { %7 = vsyncpa [#allocation3], 0  ;;  %s738_s0 = inlined_call_operand.vmem [shape: s8[2,8,128], index: 0, kind: input, shape index: {}]   ;;  %s739_s1 = inlined_call_operand.vmem [shape: s8[2,128,16], index: 1, kind: input, shape index: {}]   ;;  %s740_s2 = inlined_call_operand.hbm [shape: f32[2,8,16], index: 2, kind: output, shape index: {}]  }
   0x1   :  { %9 = vsyncpa [#allocation3 + $0x1], 0  ;;  %s623_s9 = smov 0   ;;  %s625_s10 = smov 0  }
   0x2   :  { %s627_s11 = smov 0   ;;  %s629_s12 = smov 0  }
   0x3   :  { %s631_s13 = smov 0   ;;  %s633_s14 = smov 0  }
   0x4 LB: > { %s425_s15 = sadd.s32 4294967295, %s603_s14   ;;  %s426_s16 = sadd.s32 4294967294, %s603_s14   ;;  %s603_s14 = sphi %s633_s14, %s15_s14   ;;  %s599_s13 = sphi %s631_s13, %s747_s13   ;;  %s595_s12 = sphi %s629_s12, %s746_s12   ;;  %s591_s11 = sphi %s627_s11, %s745_s11   ;;  %s587_s10 = sphi %s625_s10, %s744_s10   ;;  %s583_s9 = sphi %s623_s9, %s743_s9  }
   0x5   : > { %s41_s17 = sadd.s32 1, %s599_s13  ;;  %s112_s18 = sadd.s32 1, %s591_s11 }
   0x6   : > { %p43_p0 = scmp.ge.s32.totalorder %s41_s17, 2  ;;  %p122_p1 = scmp.ne.s32.totalorder %s591_s11, %s587_s10 }
   0x7   : > { %p123_p2 = scmp.eq.s32.totalorder %s425_s15, 1  ;;  %p128_p3 = scmp.ne.s32.totalorder %s587_s10, %s583_s9 }
   0x8   : > { %s749_s17 = smov (%p43_p0, %s41_s17), 0  ;;  %p129_p5 = scmp.eq.s32.totalorder %s426_s16, 1 }
   0x9   : > { %p663_p4 = por %p123_p2, %p122_p1  ;;  %s105_s20 = ssub.s32 %s599_s13, %s749_s17 }
   0xa   : > { %p429_p6 = scmp.ge.s32.totalorder %s603_s14, 1  ;;  %p110_p7 = scmp.eq.s32.totalorder %s105_s20, 0 }
   0xb   : > { %p670_p8 = por %p129_p5, %p128_p3  ;;  %p176_p9 = scmp.lt.s32.totalorder %s603_s14, 3 }
   0xc   : > { %s676_s22 = scalar_select %p110_p7, %s591_s11, %s112_s18  }
   0xd   : > { %p177_p10 = pnand %p429_p6, %p176_p9 }
   0xe   : > { %p215_p11 = scmp.lt.s32.totalorder (!%p177_p10), %s595_s12, 1  ;;  %v605_v0 = vmov (!%p177_p10), 0.0   ;;  %vm606_vm0 = vmmov (!%p177_p10), 0   ;;  %s212_s4 = sand.u32 (!%p177_p10), 1, %s587_s10  }
   0xf   : > { %180 = sbr.rel (%p177_p10) target bundleno = 288 (0x120), region = 28  ;;  %448 = vmatprep.subr.bf16.mxu0 (!%p177_p10), %v605_v0  ;;  %464 = vmatprep.mubr.msk.bf16.mxu0 (!%p177_p10), %vm606_vm0, %v605_v0  ;;  %s430_s5 = sshll.u32 (!%p177_p10), %s212_s4, 3 }
  0x10   : > { %s435_s6 = sshll.u32 (!%p177_p10), %s595_s12, 7  ;;  %s214_s7 = scalar_lea.vmem (!%p177_p10), [#allocation2], %s430_s5 }
  0x11   : > { %s323_s8 = sshll.u32 (!%p177_p10), %s214_s7, 4  ;;  %s691_s18 = scalar_lea.hbm (!%p177_p10), %s740_s2, %s435_s6  ;;  %s693_s8 = int_to_ptr.vmem [resolvable:$true] %s323_s8 }
  0x12   : > { %s308_s20 = scalar_lea.sflag (!%p177_p10), [#allocation3], %s212_s4 }
  0x16   : > { %s216_s23 = scalar_select %p215_p11, %s595_s12, 1 }
  0x17   : > { %s607_s12 = smov [#allocation2]  }
  0x18   : > { %s438_s24 = sshll.u32 %s216_s23, 5  ;;  %s431_s28 = sshll.u32 %s216_s23, 1 }
  0x19   : > { %s236_s27 = scalar_lea.vmem %s739_s1, %s438_s24  ;;  %s224_s3 = scalar_lea.vmem %s738_s0, %s431_s28 }
  0x1a   : > { %v246_v1 = vld [vmem:[%s236_s27] sm:$0xff]  ;;  %v247_v4 = vld [vmem:[%s236_s27 + $0x8] sm:$0xff]  ;;  %v248_v7 = vld [vmem:[%s236_s27 + $0x10] sm:$0xff]  ;;  %s525_s23 = scalar_lea.vmem %s693_s8, 128  ;;  %s529_s24 = sshll.u32 %s607_s12, 4  ;;  %s530_s24 = int_to_ptr.vmem [resolvable:$false] %s529_s24 }
  0x1b   : > { %v250_v2 = vunpack.c.l.s8.bf16 %v246_v1  ;;  %v251_v3 = vunpack.c.h.s8.bf16 %v246_v1  ;;  %v252_v5 = vunpack.c.l.s8.bf16 %v247_v4  ;;  %v253_v6 = vunpack.c.h.s8.bf16 %v247_v4  ;;  %v249_v10 = vld [vmem:[%s236_s27 + $0x18] sm:$0xff]  ;;  %v244_v13 = vld [vmem:[%s224_s3] sm:$0x3]  ;;  %p526_p12 = scmp.ne.s32.totalorder %s693_s8, %s525_s23  ;;  %s531_s25 = scalar_lea.vmem %s530_s24, 256 }
  0x1c   : > { %v254_v8 = vunpack.c.l.s8.bf16 %v248_v7  ;;  %v255_v9 = vunpack.c.h.s8.bf16 %v248_v7  ;;  %v256_v11 = vunpack.c.l.s8.bf16 %v249_v10  ;;  %v257_v12 = vunpack.c.h.s8.bf16 %v249_v10  ;;  %p532_p1 = scmp.lt.s32.totalorder %s693_s8, %s530_s24  ;;  %p533_p2 = scmp.lt.s32.totalorder %s531_s25, %s525_s23 }
  0x1d   : > { %449 = vmatpush3.bf16.msra.mxu0 %v250_v2  ;;  %v245_v14 = vunpack.c.l.s8.bf16 %v244_v13  ;;  %p527_p13 = pnand %p526_p12, %p663_p4 }
  0x1e   : > { %450 = vmatprep.subr.bf16.mxu0 %v605_v0  ;;  %p534_p3 = por %p533_p2, %p532_p1 }
  0x1f   : > { %p528_p0 = pneg %p527_p13 }
  0x21   : > { %451 = vmatpush3.bf16.msra.mxu0 %v251_v3  ;;  %p535_p5 = pnand %p534_p3, %p528_p0 }
  0x22   : > { %452 = vmatprep.subr.bf16.mxu0 %v605_v0 }
  0x25   : > { %453 = vmatpush3.bf16.msra.mxu0 %v252_v5 }
  0x26   : > { %454 = vmatprep.subr.bf16.mxu0 %v605_v0 }
  0x29   : > { %455 = vmatpush3.bf16.msra.mxu0 %v253_v6 }
  0x2a   : > { %456 = vmatprep.subr.bf16.mxu0 %v605_v0 }
  0x2d   : > { %457 = vmatpush3.bf16.msra.mxu0 %v254_v8 }
  0x2e   : > { %458 = vmatprep.subr.bf16.mxu0 %v605_v0 }
  0x31   : > { %459 = vmatpush3.bf16.msra.mxu0 %v255_v9 }
  0x32   : > { %460 = vmatprep.subr.bf16.mxu0 %v605_v0 }
  0x35   : > { %461 = vmatpush3.bf16.msra.mxu0 %v256_v11 }
  0x36   : > { %462 = vmatprep.subr.bf16.mxu0 %v605_v0 }
  0x39   : > { %463 = vmatpush3.bf16.msra.mxu0 %v257_v12 }
  0x3c   : > { %465 = vmatmul.mubr.bf16.vlgmr.msra.gmra.mrb[0].mxu0 %v245_v14 }
 0x10f   : > { %v293_v15 = vpop.f32.mrb[0].mxu0 }
 0x110   : > { %v466_v16 = vpop.f32.mrb[1].mxu0  ;;  %v305_v19 = vmul.f32 0.1, %v293_v15 }
 0x111   : > { %v296_v17 = vpop.f32.mrb[2].mxu0 }
 0x112   : > { %v467_v18 = vpop.f32.mrb[3].mxu0  ;;  %306 = vst [vmem:[%s214_s7] sm:$0xff] %v305_v19 }
 0x113   : > { %538 = shalt.err (!%p535_p5)
}
 0x114   : > { %s539_s26 = scalar_lea.hbm %s691_s18, 128  ;;  %s543_s29 = scalar_lea.hbm %s740_s2, 256 }
 0x115   : > { %p540_p6 = scmp.ne.s32.totalorder %s691_s18, %s539_s26  ;;  %p544_p10 = scmp.lt.u32.totalorder %s691_s18, %s740_s2 }
 0x116   : > { %p545_p11 = scmp.lt.u32.totalorder %s543_s29, %s539_s26  ;;  %p547_p13 = scmp.lt.u32.totalorder %s539_s26, %s691_s18 }
 0x117   : > { %p541_p7 = pnand %p540_p6, %p663_p4 }
 0x118   : > { %p546_p12 = por %p545_p11, %p544_p10 }
 0x119   : > { %p542_p9 = pneg %p541_p7 }
 0x11a   : > { %p548_p0 = por %p547_p13, %p546_p12 }
 0x11c   : > { %p549_p1 = pnand %p548_p0, %p542_p9 }
 0x11e   : > { %552 = shalt.err (!%p549_p1)
}
 0x11f   : > { %468 = dma.vmem_to_hbm [thread:$0]  (%p663_p4), %s693_s8, 128, %s691_s18, %s308_s20  }
 0x120 PF: > { %p474_p2 = scmp.ge.s32.totalorder %s603_s14, 2  ;;  %s335_s4 = sand.u32 1, %s583_s9  }
 0x121   : > { %s336_s5 = scalar_lea.sflag [#allocation3], %s335_s4 }
 0x122   : > { %p471_p3 = pnand %p474_p2, %p670_p8 }
 0x124   : > { %578 = dma.done.wait (!%p471_p3), %s336_s5, 128  }
 0x125   : > { %580 = vsyncadd (!%p471_p3), %s336_s5, 4294967168  ;;  %s15_s14 = sadd.s32 1, %s603_s14   ;;  %s743_s9 = smov %s587_s10 }
 0x126   : > { %p12_p5 = scmp.ge.s32.totalorder %s15_s14, 4   ;;  %s744_s10 = smov %s591_s11 }
 0x127   : > { %s745_s11 = smov %s676_s22  ;;  %s746_s12 = smov %s599_s13 }
 0x128   : > { %s747_s13 = smov %s749_s17  ;;  %14 = sbr.rel (!%p12_p5) target bundleno = 4 (0x4), region = 74 }
 0x12f   :  { %341 = vsyncpa [#allocation3], 1 }
 0x130   :  { %343 = vsyncpa [#allocation3 + $0x1], 1 }

</bundles_post_ra>
